<compile_context>
chip_gen: v7x
topology: tpu7x:2x2x1
jax: 0.10.0
libtpu: 0.0.40
codegen_flags: <defaults>
</compile_context>

<pallas_src>
import functools

import jax
import jax.numpy as jnp
from jax.experimental import pallas as pl
from jax.experimental.pallas import tpu as pltpu


def downsampler_kernel(x_ref, w_ref, o_ref, *, compute_dtype):
    # x_ref: (tm_p, pack*c_in) in the caller's dtype; cast to the compute
    # dtype just before the MXU dot (fuses into the VPU, no extra HBM pass).
    # w_ref: (pack*c_in, pack*c_out) block-diagonal weight, resident in VMEM.
    x = x_ref[...].astype(compute_dtype)
    y = jnp.dot(x, w_ref[...], preferred_element_type=jnp.float32)
    o_ref[...] = jnp.maximum(y, 0.0).astype(o_ref.dtype)


def _round_up(x, m):
    return ((x + m - 1) // m) * m


def downsampler(x, w, *, tm=4096, pack=None, compute_dtype=jnp.bfloat16,
                out_dtype=None):
    """relu(x @ w.T), no bias (== nn.Linear(c_in, c_out, bias=False) + ReLU).

    x: (..., c_in)    features on the last axis, any leading dims.
    w: (c_out, c_in)  PyTorch Linear weight layout.
    tm: row tile in *packed* rows (each packed row holds `pack` input rows).
    compute_dtype: MXU input dtype (bf16 default; pass jnp.float32 for exact
        parity -- the op is memory-bound so the extra MXU cost is hidden).
    out_dtype: output dtype (default: x.dtype; pass bf16 to halve write bytes).
    """
    c_out, c_in = w.shape
    lead = x.shape[:-1]
    out_dtype = x.dtype if out_dtype is None else out_dtype

    x2d = x.reshape(-1, c_in)
    M = x2d.shape[0]

    # Lane-dense packing: fold `pack` consecutive rows into one packed row so
    # the output width is >= 128 lanes (unmasked vector stores) and K is
    # MXU-aligned.
    if pack is None:
        pack = max(1, pl.cdiv(128, c_out))

    # Pad rows only up to a multiple of `pack` (needed for the packing
    # reshape); at most pack-1 rows, skipped entirely when already aligned.
    M_pack = _round_up(M, pack)
    if M_pack != M:
        x2d = jnp.pad(x2d, ((0, M_pack - M), (0, 0)))
    Mp = M_pack // pack                        # packed rows

    # Packed input view: `pack` consecutive rows concatenated along features
    # (row-major reshape => free view, no data movement, native dtype).
    xp = x2d.reshape(Mp, pack * c_in)

    # Block-diagonal weight: W_bd[(p, i), (q, o)] = w.T[i, o] * delta(p, q).
    w_t = w.T.astype(compute_dtype)            # (c_in, c_out)
    if pack > 1:
        eye = jnp.eye(pack, dtype=compute_dtype)
        w_bd = jnp.einsum("pq,io->piqo", eye, w_t).reshape(
            pack * c_in, pack * c_out)
    else:
        w_bd = w_t

    # ---- tile sizing ---------------------------------------------------
    tm = max(8, _round_up(tm, 8))
    tm_p = min(tm, _round_up(Mp, 8))           # shrink for small inputs
    if Mp >= 16:
        # Guarantee >= 2 grid steps so v7x's two TensorCores both get work.
        tm_p = min(tm_p, _round_up(pl.cdiv(Mp, 2), 8))

    # Keep the 2-deep double-buffered working set under the 32 MiB scoped
    # VMEM default on every generation (v7x only has 64 MiB physical).
    def _vmem_bytes(t):
        in_b = t * pack * c_in * x2d.dtype.itemsize
        out_b = t * pack * c_out * jnp.dtype(out_dtype).itemsize
        w_b = (pack * c_in) * (pack * c_out) * jnp.dtype(compute_dtype).itemsize
        return 2 * (in_b + out_b + w_b)

    VMEM_BUDGET = 28 * 1024 * 1024
    while tm_p > 8 and _vmem_bytes(tm_p) > VMEM_BUDGET:
        tm_p = max(8, _round_up(tm_p // 2, 8))

    grid = pl.cdiv(Mp, tm_p)                   # ragged last block is masked

    out = pl.pallas_call(
        functools.partial(downsampler_kernel, compute_dtype=compute_dtype),
        out_shape=jax.ShapeDtypeStruct((Mp, pack * c_out), out_dtype),
        grid_spec=pltpu.PrefetchScalarGridSpec(
            num_scalar_prefetch=0,
            grid=(grid,),
            in_specs=[
                pl.BlockSpec((tm_p, pack * c_in), lambda i: (i, 0)),
                # Whole (small) weight with a constant index_map -> resident.
                pl.BlockSpec((pack * c_in, pack * c_out), lambda i: (0, 0)),
            ],
            out_specs=pl.BlockSpec((tm_p, pack * c_out), lambda i: (i, 0)),
        ),
        compiler_params=pltpu.CompilerParams(
            dimension_semantics=("parallel",),
        ),
    )(xp, w_bd)

    # Unpack: (Mp, pack*c_out) -> (M_pack, c_out) is a free view; drop the
    # <= pack-1 padded rows and restore leading dims.
    y = out.reshape(M_pack, c_out)[:M]
    return y.reshape(*lead, c_out)


if __name__ == "__main__":
    # Small shapes consistent with the module's forward (features last axis).
    batch, seq, c_in, reduction = 2, 8, 32, 2
    c_out = c_in // reduction

    key = jax.random.PRNGKey(0)
    kx, kw, kx2, kx3 = jax.random.split(key, 4)

    x = jax.random.normal(kx, (batch, seq, c_in), dtype=jnp.float32)
    # PyTorch Linear weight shape is (c_out, c_in); deterministic synthetic init.
    bound = 1.0 / (c_in ** 0.5)
    w = jax.random.uniform(kw, (c_out, c_in), dtype=jnp.float32,
                           minval=-bound, maxval=bound)

    # --- test 1: basic small shape (single grid step, OOB-masked block) ------
    y = jax.block_until_ready(downsampler(x, w))
    y_ref = jnp.maximum(jnp.einsum("bsc,oc->bso", x, w), 0.0)
    assert y.shape == (batch, seq, c_out)
    # bf16 matmul with f32 accumulation -> loose tolerance vs f32 reference.
    assert jnp.allclose(y, y_ref, atol=3e-2, rtol=3e-2), float(
        jnp.max(jnp.abs(y - y_ref)))

    # --- test 2: ragged row count + multi-step grid + ragged last block ------
    x2 = jax.random.normal(kx2, (3, 100, c_in), dtype=jnp.float32)
    y2 = jax.block_until_ready(downsampler(x2, w, tm=16))
    y2_ref = jnp.maximum(jnp.einsum("bsc,oc->bso", x2, w), 0.0)
    assert y2.shape == (3, 100, c_out)
    assert jnp.allclose(y2, y2_ref, atol=3e-2, rtol=3e-2), float(
        jnp.max(jnp.abs(y2 - y2_ref)))

    # --- test 3: default tile, auto 2-way split (megacore path), no padding --
    x3 = jax.random.normal(kx3, (4, 128, c_in), dtype=jnp.float32)
    y3 = jax.block_until_ready(downsampler(x3, w))
    y3_ref = jnp.maximum(jnp.einsum("bsc,oc->bso", x3, w), 0.0)
    assert y3.shape == (4, 128, c_out)
    assert jnp.allclose(y3, y3_ref, atol=3e-2, rtol=3e-2), float(
        jnp.max(jnp.abs(y3 - y3_ref)))

    print("KERNEL_OK")
</pallas_src>

<mosaic_0001>
module attributes {stable_mosaic.version = 11 : i64} {
  func.func @downsampler_kernel(%arg0: i32, %arg1: memref<8x256xf32, #tpu.memory_space<vmem>>, %arg2: memref<256x128xbf16, #tpu.memory_space<vmem>>, %arg3: memref<8x128xf32, #tpu.memory_space<vmem>>) attributes {dimension_semantics = [#tpu.dimension_semantics<parallel>], iteration_bounds = array<i64: 1>, scalar_prefetch = 0 : i64, scratch_operands = 0 : i64, tpu.core_type = #tpu.core_type<tc>, window_params = [{transform_indices = @transform_0, window_bounds = array<i64: 8, 256>}, {pipeline_mode = #tpu.pipeline_mode<synchronous>, transform_indices = @transform_1, window_bounds = array<i64: 256, 128>}, {transform_indices = @transform_2, window_bounds = array<i64: 8, 128>}]} {
    %c0 = arith.constant 0 : index
    %c0_0 = arith.constant 0 : index
    %0 = vector.load %arg1[%c0, %c0_0] : memref<8x256xf32, #tpu.memory_space<vmem>>, vector<8x256xf32>
    %1 = arith.truncf %0 : vector<8x256xf32> to vector<8x256xbf16>
    %c0_1 = arith.constant 0 : index
    %c0_2 = arith.constant 0 : index
    %2 = vector.load %arg2[%c0_1, %c0_2] : memref<256x128xbf16, #tpu.memory_space<vmem>>, vector<256x128xbf16>
    %cst = arith.constant dense<0.000000e+00> : vector<8x128xf32>
    %3 = tpu.matmul %1, %2, %cst {dimension_numbers = #tpu.dot_dimension_numbers<[1], [0], [0], [1], [0, 0, 1, 1], [], []>} : vector<8x256xbf16>, vector<256x128xbf16>, vector<8x128xf32> -> vector<8x128xf32>
    %cst_3 = arith.constant 0.000000e+00 : f32
    %4 = vector.broadcast %cst_3 : f32 to vector<8x128xf32>
    %5 = arith.maximumf %3, %4 : vector<8x128xf32>
    %c0_4 = arith.constant 0 : index
    %c0_5 = arith.constant 0 : index
    %6 = vector.load %arg3[%c0_4, %c0_5] : memref<8x128xf32, #tpu.memory_space<vmem>>, vector<8x128xf32>
    tpu.vector_store %arg3[%c0_4, %c0_5], %5 {strides = array<i32>} : memref<8x128xf32, #tpu.memory_space<vmem>>, vector<8x128xf32>,
    return
  }
  func.func @transform_0(%arg0: i32) -> (i32, i32) {
    %c0_i32 = arith.constant 0 : i32
    %c0_i32_0 = arith.constant 0 : i32
    return %arg0, %c0_i32 : i32, i32
  }
  func.func @transform_1(%arg0: i32) -> (i32, i32) {
    %c0_i32 = arith.constant 0 : i32
    %c0_i32_0 = arith.constant 0 : i32
    %c0_i32_1 = arith.constant 0 : i32
    return %c0_i32, %c0_i32_0 : i32, i32
  }
  func.func @transform_2(%arg0: i32) -> (i32, i32) {
    %c0_i32 = arith.constant 0 : i32
    %c0_i32_0 = arith.constant 0 : i32
    return %arg0, %c0_i32 : i32, i32
  }
}

</mosaic_0001>

<bundles_post_ra>
// kernel: tpu_custom_call.1
= control target key start
LH: loop header
LB: loop body
LE: loop exit
PB: predicated region body
PF: predicated region fallthrough
CT: control target
= control target key end

     0   :  { %7 = vsyncpa [#allocation3], 0  ;;  %s455_s0 = inlined_call_operand.hbm [shape: f32[2,256], index: 0, kind: input, shape index: {}]   ;;  %s456_s1 = inlined_call_operand.hbm [shape: bf16[256,128], index: 1, kind: input, shape index: {}]   ;;  %s457_s2 = inlined_call_operand.hbm [shape: f32[2,128], index: 2, kind: output, shape index: {}]  }
   0x1   :  { %8 = vsyncpa [#allocation6], 0 }
   0x2   :  { %9 = vsyncpa [#allocation4], 0 }
   0x3   :  { %14 = vsyncadd [#allocation3], 192  ;;  %s397_s9 = smov [#allocation2]   ;;  %s325_s13 = scalar_lea.hbm %s455_s0, 64 }
   0x4   :  { %s15_s10 = sshll.u32 %s397_s9, 4  ;;  %p326_p0 = scmp.ne.s32.totalorder %s455_s0, %s325_s13  ;;  %s16_s10 = int_to_ptr.vmem [resolvable:$true] %s15_s10 }
   0x5   :  { %p329_p1 = scmp.lt.u32.totalorder %s325_s13, %s455_s0 }
   0x7   :  { %p331_p2 = pnand %p329_p1, %p326_p0 }
   0x9   :  { %334 = shalt.err (!%p331_p2)
}
   0xa   :  { %s335_s18 = scalar_lea.vmem %s16_s10, 64  ;;  %s339_s19 = scalar_lea.vmem %s16_s10, 256 }
   0xb   :  { %p336_p3 = scmp.ne.s32.totalorder %s16_s10, %s335_s18  ;;  %p340_p4 = scmp.lt.s32.totalorder %s16_s10, %s16_s10 }
   0xc   :  { %p341_p5 = scmp.lt.s32.totalorder %s339_s19, %s335_s18 }
   0xe   :  { %p342_p6 = por %p341_p5, %p340_p4 }
  0x10   :  { %p343_p7 = pnand %p342_p6, %p336_p3 }
  0x12   :  { %346 = shalt.err (!%p343_p7)
}
  0x13   :  { %s398_s20 = smov 64   ;;  %s399_s21 = smov 4  }
  0x14   :  { %21 = dma.hbm_to_vmem [thread:$0]  %s455_s0, 64, %s16_s10, [#allocation3], %s398_s20, %s398_s20, %s399_s21  }
  0x15   :  { %s400_s24 = smov [#allocation5]   ;;  %s347_s28 = scalar_lea.hbm %s456_s1, 2048 }
  0x16   :  { %s27_s25 = sshll.u32 %s400_s24, 4  ;;  %p348_p8 = scmp.ne.s32.totalorder %s456_s1, %s347_s28  ;;  %s28_s25 = int_to_ptr.vmem [resolvable:$true] %s27_s25 }
  0x17   :  { %p351_p9 = scmp.lt.u32.totalorder %s347_s28, %s456_s1 }
  0x19   :  { %p353_p10 = pnand %p351_p9, %p348_p8 }
  0x1b   :  { %356 = shalt.err (!%p353_p10)
}
  0x1c   :  { %s357_s5 = scalar_lea.vmem %s28_s25, 2048  ;;  %p362_p12 = scmp.lt.s32.totalorder %s28_s25, %s28_s25 }
  0x1d   :  { %p358_p11 = scmp.ne.s32.totalorder %s28_s25, %s357_s5  ;;  %p363_p13 = scmp.lt.s32.totalorder %s357_s5, %s357_s5 }
  0x1f   :  { %p364_p0 = por %p363_p13, %p362_p12 }
  0x21   :  { %p365_p1 = pnand %p364_p0, %p358_p11 }
  0x23   :  { %368 = shalt.err (!%p365_p1)
}
  0x24   :  { %33 = dma.hbm_to_vmem [thread:$0]  %s456_s1, 2048, %s28_s25, [#allocation6], %s398_s20, %s398_s20, %s399_s21  }
  0x25   :  { %391 = dma.done.wait [#allocation3], 256  }
  0x26   :  { %392 = vsyncadd [#allocation3], 4294967040 }
  0x27   :  { %393 = dma.done.wait [#allocation6], 2048  }
  0x28   :  { %394 = vsyncadd [#allocation6], 4294965248  ;;  %v305_v0 = vld [vmem:[#allocation5 + $0x40] sm:$0xff]   ;;  %v307_v2 = vld [vmem:[#allocation5 + $0x48] sm:$0xff]  }
  0x29   :  { %v306_v1 = vld [vmem:[#allocation5] sm:$0xff]   ;;  %275 = vmatprep.subr.bf16.mxu0 %v305_v0  ;;  %v308_v3 = vld [vmem:[#allocation5 + $0x8] sm:$0xff]   ;;  %v309_v4 = vld [vmem:[#allocation5 + $0x50] sm:$0xff]  }
  0x2a   :  { %276 = vmatpush3.bf16.msra.mxu0 %v306_v1  ;;  %v310_v5 = vld [vmem:[#allocation5 + $0x10] sm:$0xff]   ;;  %v311_v6 = vld [vmem:[#allocation5 + $0x58] sm:$0xff]   ;;  %v313_v8 = vld [vmem:[#allocation5 + $0x60] sm:$0xff]  }
  0x2b   :  { %277 = vmatprep.subr.bf16.mxu0 %v307_v2  ;;  %v312_v7 = vld [vmem:[#allocation5 + $0x18] sm:$0xff]   ;;  %v314_v9 = vld [vmem:[#allocation5 + $0x20] sm:$0xff]   ;;  %v315_v10 = vld [vmem:[#allocation5 + $0x68] sm:$0xff]  }
  0x2c   :  { %v323_v11 = vld.sshfl [vmem:[#allocation2] sm:$0xff pattern:$0x76325410]  ;;  %v324_v12 = vld.sshfl [vmem:[#allocation2 + $0x8] sm:$0xff pattern:$0x76325410] }
  0x2d   :  { %v316_v13 = vld [vmem:[#allocation5 + $0x28] sm:$0xff]   ;;  %v317_v14 = vld [vmem:[#allocation5 + $0x70] sm:$0xff]   ;;  %v66_v15 = vcombine.high %v323_v11, %v324_v12  ;;  %v319_v18 = vld [vmem:[#allocation5 + $0x78] sm:$0xff]   ;;  %v65_v19 = vcombine.low %v323_v11, %v324_v12 }
  0x2e   :  { %278 = vmatpush3.bf16.msra.mxu0 %v308_v3  ;;  %v318_v16 = vld [vmem:[#allocation5 + $0x30] sm:$0xff]   ;;  %v320_v20 = vld [vmem:[#allocation5 + $0x38] sm:$0xff]  }
  0x2f   :  { %279 = vmatprep.subr.bf16.mxu0 %v309_v4  ;;  %v70_v17 = vpack.c.bf16 %v66_v15, %v66_v15  ;;  %v69_v21 = vpack.c.bf16 %v65_v19, %v65_v19 }
  0x31   :  { %231 = vmatprep.mubr.bf16.mxu0 %v70_v17 }
  0x32   :  { %280 = vmatpush3.bf16.msra.mxu0 %v310_v5 }
  0x33   :  { %281 = vmatprep.subr.bf16.mxu0 %v311_v6 }
  0x36   :  { %282 = vmatpush3.bf16.msra.mxu0 %v312_v7 }
  0x37   :  { %283 = vmatprep.subr.bf16.mxu0 %v313_v8 }
  0x3a   :  { %284 = vmatpush3.bf16.msra.mxu0 %v314_v9 }
  0x3b   :  { %285 = vmatprep.subr.bf16.mxu0 %v315_v10 }
  0x3e   :  { %286 = vmatpush3.bf16.msra.mxu0 %v316_v13 }
  0x3f   :  { %287 = vmatprep.subr.bf16.mxu0 %v317_v14 }
  0x42   :  { %288 = vmatpush3.bf16.msra.mxu0 %v318_v16 }
  0x43   :  { %289 = vmatprep.subr.bf16.mxu0 %v319_v18 }
  0x46   :  { %290 = vmatpush3.bf16.msra.mxu0 %v320_v20 }
  0x49   :  { %232 = vmatmul.mubr.bf16.vlgmr.msra.gmra.mrb[0].mxu0 %v69_v21 }
 0x11c   :  { %v291_v22 = vpop.f32.mrb[0].mxu0 }
 0x11d   :  { %v292_v23 = vpop.f32.mrb[1].mxu0 }
 0x11e   :  { %v293_v24 = vadd.f32 %v292_v23, %v291_v22  ;;  %v294_v25 = vpop.f32.mrb[2].mxu0 }
 0x11f   :  { %v295_v26 = vpop.f32.mrb[3].mxu0 }
 0x120   :  { %v239_v27 = vmax.f32 %v293_v24, 0.0 }
 0x122   :  { %240 = vst [vmem:[#allocation7] sm:$0xff] %v239_v27 }
 0x123   :  { %245 = vsyncadd [#allocation4], 96  ;;  %s401_s1 = smov [#allocation7]  }
 0x124   :  { %s246_s7 = sshll.u32 %s401_s1, 4  ;;  %s247_s7 = int_to_ptr.vmem [resolvable:$true] %s246_s7 }
 0x125   :  { %s369_s8 = scalar_lea.vmem %s247_s7, 32  ;;  %s373_s9 = scalar_lea.vmem %s247_s7, 128 }
 0x126   :  { %p370_p2 = scmp.ne.s32.totalorder %s247_s7, %s369_s8  ;;  %p374_p3 = scmp.lt.s32.totalorder %s247_s7, %s247_s7 }
 0x127   :  { %p375_p4 = scmp.lt.s32.totalorder %s373_s9, %s369_s8 }
 0x129   :  { %p376_p5 = por %p375_p4, %p374_p3 }
 0x12b   :  { %p377_p6 = pnand %p376_p5, %p370_p2 }
 0x12d   :  { %380 = shalt.err (!%p377_p6)
}
 0x12e   :  { %s381_s12 = scalar_lea.hbm %s457_s2, 32 }
 0x12f   :  { %p382_p7 = scmp.ne.s32.totalorder %s457_s2, %s381_s12  ;;  %p385_p8 = scmp.lt.u32.totalorder %s381_s12, %s457_s2 }
 0x131   :  { %p387_p9 = pnand %p385_p8, %p382_p7 }
 0x133   :  { %390 = shalt.err (!%p387_p9)
}
 0x134   :  { %s402_s17 = smov 32   ;;  %s403_s18 = smov 2  }
 0x135   :  { %252 = dma.vmem_to_hbm [thread:$0]  %s247_s7, 32, %s457_s2, [#allocation4], %s402_s17, %s402_s17, %s403_s18  }
 0x136   :  { %395 = dma.done.wait [#allocation4], 128  }
 0x137   :  { %396 = vsyncadd [#allocation4], 4294967168 }
 0x138   :  { %256 = vsyncpa [#allocation3], 1 }
 0x139   :  { %257 = vsyncpa [#allocation6], 1 }
 0x13a   :  { %258 = vsyncpa [#allocation4], 1 }

</bundles_post_ra>
